<compile_context>
chip_gen: v7x
topology: tpu7x:2x2x1
jax: 0.10.0
libtpu: 0.0.40
codegen_flags: <defaults>
</compile_context>

<pallas_src>
import functools

import jax
import jax.numpy as jnp
from jax.experimental import pallas as pl
from jax.experimental.pallas import tpu as pltpu

EPS = 1e-5          # nn.InstanceNorm2d default eps
NEG_SLOPE = 0.01    # nn.LeakyReLU negative_slope


def bottleneck_kernel(x_ref, mask_ref, w1_ref, b1_ref, w2_ref, b2_ref,
                      o_ref, stk1_ref, stk2_ref, *, H, W):
    HW = H * W
    masks = mask_ref[...]                      # (9, HW) f32 {0,1} "same"-padding masks

    # Static lane shifts: tap (dy, dx) needs x[., p + (dy-1)*W + (dx-1)],
    # i.e. roll by shift = -offset (np.roll semantics: out[i] = x[i - shift]).
    shifts = [(-((dy - 1) * W + (dx - 1))) % HW
              for dy in range(3) for dx in range(3)]

    def stack_taps(v, stk_ref):
        # v: (R, HW)  ->  stk_ref filled as (9*R, HW), tap-major.
        # R is a multiple of 8, so every slab store is a full, unmasked tile row.
        R = v.shape[0]
        for k, sh in enumerate(shifts):
            if k == 4:                                        # center tap: no shift, all-ones mask
                stk_ref[k * R:(k + 1) * R, :] = v
            else:
                stk_ref[k * R:(k + 1) * R, :] = (
                    pltpu.roll(v, shift=sh, axis=1) * masks[k:k + 1, :])
        return stk_ref[...]

    def inorm_lrelu(y):
        # per-(image, channel) stats over the H*W lane axis; single fused pass
        inv_hw = 1.0 / HW
        s1 = jnp.sum(y, axis=1, keepdims=True)
        s2 = jnp.sum(y * y, axis=1, keepdims=True)
        mean = s1 * inv_hw
        var = jnp.maximum(s2 * inv_hw - mean * mean, 0.0)     # biased, as in PyTorch
        yn = (y - mean) * jax.lax.rsqrt(var + EPS)
        return jnp.where(yn >= 0, yn, NEG_SLOPE * yn)

    x = x_ref[...]                                            # (NB*Cin_p, HW)

    # conv1: single matmul, K = 9*NB*Cin_p
    y1 = jnp.dot(w1_ref[...], stack_taps(x, stk1_ref),
                 preferred_element_type=jnp.float32) + b1_ref[...]
    y1 = inorm_lrelu(y1)                                      # (NB*Cmid_p, HW)

    # conv2: single matmul, K = 9*NB*Cmid_p
    y2 = jnp.dot(w2_ref[...], stack_taps(y1, stk2_ref),
                 preferred_element_type=jnp.float32) + b2_ref[...]
    o_ref[...] = inorm_lrelu(y2)                              # lane-dense (NB*Cout_p, HW) store


def _pad8(c):
    return max(8, ((c + 7) // 8) * 8)


def _block_diag_tap_weights(w_oihw, cin_pad, cout_pad, nb):
    """PyTorch OIHW (O,I,3,3) -> block-diagonal (nb*cout_pad, 9*nb*cin_pad)."""
    O, I = w_oihw.shape[0], w_oihw.shape[1]
    w_taps = jnp.transpose(w_oihw, (2, 3, 0, 1)).reshape(9, O, I)        # k = dy*3+dx
    w_taps = jnp.pad(w_taps, ((0, 0), (0, cout_pad - O), (0, cin_pad - I)))
    eye = jnp.eye(nb, dtype=w_taps.dtype)                                # (nb, nb)
    # big[i, o, k, j, c] = eye[i, j] * w_taps[k, o, c]
    big = jnp.einsum('ij,koc->iokjc', eye, w_taps)
    return big.reshape(nb * cout_pad, 9 * nb * cin_pad)


def _default_images_per_step(n):
    # Few, fat grid steps: whole batch in one step on single-TC chips (v5e/v6e);
    # two "parallel" steps on v7x so both TensorCores get work.
    try:
        kind = jax.devices()[0].device_kind.lower()
    except Exception:
        kind = ""
    if ("v7" in kind or "7x" in kind) and n >= 2 and n % 2 == 0:
        return n // 2
    return n


def bottleneck_pallas(x_nchw, w1_oihw, b1, w2_oihw, b2, *, images_per_step=None):
    """x_nchw: (N, Cin, H, W) float32. Weights in PyTorch OIHW layout."""
    N, Cin, H, W = x_nchw.shape
    Cmid, Cout = w1_oihw.shape[0], w2_oihw.shape[0]
    HW = H * W

    cin_p, cmid_p, cout_p = _pad8(Cin), _pad8(Cmid), _pad8(Cout)

    NB = images_per_step if images_per_step is not None else _default_images_per_step(N)
    assert N % NB == 0, "images_per_step must divide the batch"

    # Free layout glue: stay NCHW, flatten HW onto lanes, pad channels to 8.
    x = x_nchw.reshape(N, Cin, HW).astype(jnp.float32)
    x = jnp.pad(x, ((0, 0), (0, cin_p - Cin), (0, 0))).reshape(N * cin_p, HW)

    # Block-diagonal (over images), tap-stacked weights + tiled biases.
    w1_big = _block_diag_tap_weights(w1_oihw.astype(jnp.float32), cin_p, cmid_p, NB)
    w2_big = _block_diag_tap_weights(w2_oihw.astype(jnp.float32), cmid_p, cout_p, NB)
    b1_big = jnp.tile(jnp.pad(b1.astype(jnp.float32), (0, cmid_p - Cmid)), NB).reshape(NB * cmid_p, 1)
    b2_big = jnp.tile(jnp.pad(b2.astype(jnp.float32), (0, cout_p - Cout)), NB).reshape(NB * cout_p, 1)

    # Boundary ("same" zero padding) masks for the 9 taps, flattened row-major
    # to match the HW lane flattening of x (also suppresses cross-row roll wrap).
    yy = jnp.arange(H).reshape(H, 1)
    xx = jnp.arange(W).reshape(1, W)
    mask_rows = []
    for dy in range(3):
        for dx in range(3):
            oy, ox = dy - 1, dx - 1
            valid = ((yy + oy >= 0) & (yy + oy < H) &
                     (xx + ox >= 0) & (xx + ox < W))
            mask_rows.append(valid.reshape(HW))
    mask_arr = jnp.stack(mask_rows, axis=0).astype(jnp.float32)          # (9, HW)

    out = pl.pallas_call(
        functools.partial(bottleneck_kernel, H=H, W=W),
        out_shape=jax.ShapeDtypeStruct((N * cout_p, HW), jnp.float32),
        grid_spec=pltpu.PrefetchScalarGridSpec(
            num_scalar_prefetch=0,
            grid=(N // NB,),
            in_specs=[
                pl.BlockSpec((NB * cin_p, HW), lambda n: (n, 0)),                 # x
                pl.BlockSpec((9, HW), lambda n: (0, 0)),                          # masks
                pl.BlockSpec((NB * cmid_p, 9 * NB * cin_p), lambda n: (0, 0)),    # w1
                pl.BlockSpec((NB * cmid_p, 1), lambda n: (0, 0)),                 # b1
                pl.BlockSpec((NB * cout_p, 9 * NB * cmid_p), lambda n: (0, 0)),   # w2
                pl.BlockSpec((NB * cout_p, 1), lambda n: (0, 0)),                 # b2
            ],
            out_specs=pl.BlockSpec((NB * cout_p, HW), lambda n: (n, 0)),
            scratch_shapes=[
                pltpu.VMEM((9 * NB * cin_p, HW), jnp.float32),    # tap-stacked conv1 operand
                pltpu.VMEM((9 * NB * cmid_p, HW), jnp.float32),   # tap-stacked conv2 operand
            ]),
        compiler_params=pltpu.CompilerParams(
            dimension_semantics=("parallel",)),
    )(x, mask_arr, w1_big, b1_big, w2_big, b2_big)

    # (N*Cout_p, HW) -> NCHW; drop the zero-padded channels (tiny slice).
    return out.reshape(N, cout_p, H, W)[:, :Cout]


# ---------------- pure-JAX reference for verification ----------------
def bottleneck_ref(x_nchw, w1_oihw, b1, w2_oihw, b2):
    x = jnp.transpose(x_nchw, (0, 2, 3, 1))

    def conv(x_nhwc, w_oihw, b):
        w = jnp.transpose(w_oihw, (2, 3, 1, 0))
        y = jax.lax.conv_general_dilated(
            x_nhwc, w, window_strides=(1, 1), padding="SAME",
            dimension_numbers=("NHWC", "HWIO", "NHWC"))
        return y + b[None, None, None, :]

    def in_lrelu(y):
        mean = jnp.mean(y, axis=(1, 2), keepdims=True)
        var = jnp.mean((y - mean) ** 2, axis=(1, 2), keepdims=True)
        yn = (y - mean) * jax.lax.rsqrt(var + EPS)
        return jnp.where(yn >= 0, yn, NEG_SLOPE * yn)

    y = in_lrelu(conv(x, w1_oihw, b1))
    y = in_lrelu(conv(y, w2_oihw, b2))
    return jnp.transpose(y, (0, 3, 1, 2))


if __name__ == "__main__":
    # BottleNeck(in_channels=4, mid_channels=8, out_channels=4, bias=True)
    N, Cin, Cmid, Cout, H, W = 2, 4, 8, 4, 16, 16

    key = jax.random.PRNGKey(0)
    kx, kw1, kb1, kw2, kb2 = jax.random.split(key, 5)
    x = jax.random.normal(kx, (N, Cin, H, W), dtype=jnp.float32)
    w1 = jax.random.normal(kw1, (Cmid, Cin, 3, 3), dtype=jnp.float32) * 0.1
    b1 = jax.random.normal(kb1, (Cmid,), dtype=jnp.float32) * 0.1
    w2 = jax.random.normal(kw2, (Cout, Cmid, 3, 3), dtype=jnp.float32) * 0.1
    b2 = jax.random.normal(kb2, (Cout,), dtype=jnp.float32) * 0.1

    out = jax.block_until_ready(bottleneck_pallas(x, w1, b1, w2, b2))
    ref = jax.block_until_ready(bottleneck_ref(x, w1, b1, w2, b2))

    assert out.shape == (N, Cout, H, W), out.shape
    assert jnp.allclose(out, ref, atol=1e-4, rtol=1e-4), \
        float(jnp.max(jnp.abs(out - ref)))

    print("KERNEL_OK")
</pallas_src>

<mosaic_0001>
module attributes {stable_mosaic.version = 11 : i64} {
  func.func @bottleneck_kernel(%arg0: i32, %arg1: memref<16x256xf32, #tpu.memory_space<vmem>>, %arg2: memref<9x256xf32, #tpu.memory_space<vmem>>, %arg3: memref<16x144xf32, #tpu.memory_space<vmem>>, %arg4: memref<16x1xf32, #tpu.memory_space<vmem>>, %arg5: memref<16x144xf32, #tpu.memory_space<vmem>>, %arg6: memref<16x1xf32, #tpu.memory_space<vmem>>, %arg7: memref<16x256xf32, #tpu.memory_space<vmem>>, %arg8: memref<144x256xf32, #tpu.memory_space<vmem>>, %arg9: memref<144x256xf32, #tpu.memory_space<vmem>>) attributes {dimension_semantics = [#tpu.dimension_semantics<parallel>], iteration_bounds = array<i64: 1>, scalar_prefetch = 0 : i64, scratch_operands = 2 : i64, tpu.core_type = #tpu.core_type<tc>, window_params = [{transform_indices = @transform_0, window_bounds = array<i64: 16, 256>}, {pipeline_mode = #tpu.pipeline_mode<synchronous>, transform_indices = @transform_1, window_bounds = array<i64: 9, 256>}, {pipeline_mode = #tpu.pipeline_mode<synchronous>, transform_indices = @transform_2, window_bounds = array<i64: 16, 144>}, {pipeline_mode = #tpu.pipeline_mode<synchronous>, transform_indices = @transform_3, window_bounds = array<i64: 16, 1>}, {pipeline_mode = #tpu.pipeline_mode<synchronous>, transform_indices = @transform_4, window_bounds = array<i64: 16, 144>}, {pipeline_mode = #tpu.pipeline_mode<synchronous>, transform_indices = @transform_5, window_bounds = array<i64: 16, 1>}, {transform_indices = @transform_6, window_bounds = array<i64: 16, 256>}]} {
    %c0 = arith.constant 0 : index
    %c0_0 = arith.constant 0 : index
    %0 = vector.load %arg2[%c0, %c0_0] : memref<9x256xf32, #tpu.memory_space<vmem>>, vector<9x256xf32>
    %c0_1 = arith.constant 0 : index
    %c0_2 = arith.constant 0 : index
    %1 = vector.load %arg1[%c0_1, %c0_2] : memref<16x256xf32, #tpu.memory_space<vmem>>, vector<16x256xf32>
    %c0_3 = arith.constant 0 : index
    %c0_4 = arith.constant 0 : index
    %2 = vector.load %arg3[%c0_3, %c0_4] : memref<16x144xf32, #tpu.memory_space<vmem>>, vector<16x144xf32>
    %c17_i32 = arith.constant 17 : i32
    %3 = tpu.dynamic_rotate %1 by %c17_i32 dim 1 : vector<16x256xf32>, i32 -> vector<16x256xf32>
    %4 = vector.extract_strided_slice %0 {offsets = [0, 0], sizes = [1, 256], strides = [1, 1]} : vector<9x256xf32> to vector<1x256xf32>
    %5 = vector.broadcast %4 : vector<1x256xf32> to vector<16x256xf32>
    %6 = arith.mulf %3, %5 : vector<16x256xf32>
    %c0_5 = arith.constant 0 : index
    %c0_6 = arith.constant 0 : index
    %7 = vector.load %arg8[%c0_5, %c0_6] : memref<144x256xf32, #tpu.memory_space<vmem>>, vector<16x256xf32>
    tpu.vector_store %arg8[%c0_5, %c0_6], %6 {strides = array<i32>} : memref<144x256xf32, #tpu.memory_space<vmem>>, vector<16x256xf32>,
    %c16_i32 = arith.constant 16 : i32
    %8 = tpu.dynamic_rotate %1 by %c16_i32 dim 1 : vector<16x256xf32>, i32 -> vector<16x256xf32>
    %9 = vector.extract_strided_slice %0 {offsets = [1, 0], sizes = [1, 256], strides = [1, 1]} : vector<9x256xf32> to vector<1x256xf32>
    %10 = vector.broadcast %9 : vector<1x256xf32> to vector<16x256xf32>
    %11 = arith.mulf %8, %10 : vector<16x256xf32>
    %c16 = arith.constant 16 : index
    %c0_7 = arith.constant 0 : index
    %12 = vector.load %arg8[%c16, %c0_7] : memref<144x256xf32, #tpu.memory_space<vmem>>, vector<16x256xf32>
    tpu.vector_store %arg8[%c16, %c0_7], %11 {strides = array<i32>} : memref<144x256xf32, #tpu.memory_space<vmem>>, vector<16x256xf32>,
    %c15_i32 = arith.constant 15 : i32
    %13 = tpu.dynamic_rotate %1 by %c15_i32 dim 1 : vector<16x256xf32>, i32 -> vector<16x256xf32>
    %14 = vector.extract_strided_slice %0 {offsets = [2, 0], sizes = [1, 256], strides = [1, 1]} : vector<9x256xf32> to vector<1x256xf32>
    %15 = vector.broadcast %14 : vector<1x256xf32> to vector<16x256xf32>
    %16 = arith.mulf %13, %15 : vector<16x256xf32>
    %c32 = arith.constant 32 : index
    %c0_8 = arith.constant 0 : index
    %17 = vector.load %arg8[%c32, %c0_8] : memref<144x256xf32, #tpu.memory_space<vmem>>, vector<16x256xf32>
    tpu.vector_store %arg8[%c32, %c0_8], %16 {strides = array<i32>} : memref<144x256xf32, #tpu.memory_space<vmem>>, vector<16x256xf32>,
    %c1_i32 = arith.constant 1 : i32
    %18 = tpu.dynamic_rotate %1 by %c1_i32 dim 1 : vector<16x256xf32>, i32 -> vector<16x256xf32>
    %19 = vector.extract_strided_slice %0 {offsets = [3, 0], sizes = [1, 256], strides = [1, 1]} : vector<9x256xf32> to vector<1x256xf32>
    %20 = vector.broadcast %19 : vector<1x256xf32> to vector<16x256xf32>
    %21 = arith.mulf %18, %20 : vector<16x256xf32>
    %c48 = arith.constant 48 : index
    %c0_9 = arith.constant 0 : index
    %22 = vector.load %arg8[%c48, %c0_9] : memref<144x256xf32, #tpu.memory_space<vmem>>, vector<16x256xf32>
    tpu.vector_store %arg8[%c48, %c0_9], %21 {strides = array<i32>} : memref<144x256xf32, #tpu.memory_space<vmem>>, vector<16x256xf32>,
    %c64 = arith.constant 64 : index
    %c0_10 = arith.constant 0 : index
    %23 = vector.load %arg8[%c64, %c0_10] : memref<144x256xf32, #tpu.memory_space<vmem>>, vector<16x256xf32>
    tpu.vector_store %arg8[%c64, %c0_10], %1 {strides = array<i32>} : memref<144x256xf32, #tpu.memory_space<vmem>>, vector<16x256xf32>,
    %c255_i32 = arith.constant 255 : i32
    %24 = tpu.dynamic_rotate %1 by %c255_i32 dim 1 : vector<16x256xf32>, i32 -> vector<16x256xf32>
    %25 = vector.extract_strided_slice %0 {offsets = [5, 0], sizes = [1, 256], strides = [1, 1]} : vector<9x256xf32> to vector<1x256xf32>
    %26 = vector.broadcast %25 : vector<1x256xf32> to vector<16x256xf32>
    %27 = arith.mulf %24, %26 : vector<16x256xf32>
    %c80 = arith.constant 80 : index
    %c0_11 = arith.constant 0 : index
    %28 = vector.load %arg8[%c80, %c0_11] : memref<144x256xf32, #tpu.memory_space<vmem>>, vector<16x256xf32>
    tpu.vector_store %arg8[%c80, %c0_11], %27 {strides = array<i32>} : memref<144x256xf32, #tpu.memory_space<vmem>>, vector<16x256xf32>,
    %c241_i32 = arith.constant 241 : i32
    %29 = tpu.dynamic_rotate %1 by %c241_i32 dim 1 : vector<16x256xf32>, i32 -> vector<16x256xf32>
    %30 = vector.extract_strided_slice %0 {offsets = [6, 0], sizes = [1, 256], strides = [1, 1]} : vector<9x256xf32> to vector<1x256xf32>
    %31 = vector.broadcast %30 : vector<1x256xf32> to vector<16x256xf32>
    %32 = arith.mulf %29, %31 : vector<16x256xf32>
    %c96 = arith.constant 96 : index
    %c0_12 = arith.constant 0 : index
    %33 = vector.load %arg8[%c96, %c0_12] : memref<144x256xf32, #tpu.memory_space<vmem>>, vector<16x256xf32>
    tpu.vector_store %arg8[%c96, %c0_12], %32 {strides = array<i32>} : memref<144x256xf32, #tpu.memory_space<vmem>>, vector<16x256xf32>,
    %c240_i32 = arith.constant 240 : i32
    %34 = tpu.dynamic_rotate %1 by %c240_i32 dim 1 : vector<16x256xf32>, i32 -> vector<16x256xf32>
    %35 = vector.extract_strided_slice %0 {offsets = [7, 0], sizes = [1, 256], strides = [1, 1]} : vector<9x256xf32> to vector<1x256xf32>
    %36 = vector.broadcast %35 : vector<1x256xf32> to vector<16x256xf32>
    %37 = arith.mulf %34, %36 : vector<16x256xf32>
    %c112 = arith.constant 112 : index
    %c0_13 = arith.constant 0 : index
    %38 = vector.load %arg8[%c112, %c0_13] : memref<144x256xf32, #tpu.memory_space<vmem>>, vector<16x256xf32>
    tpu.vector_store %arg8[%c112, %c0_13], %37 {strides = array<i32>} : memref<144x256xf32, #tpu.memory_space<vmem>>, vector<16x256xf32>,
    %c239_i32 = arith.constant 239 : i32
    %39 = tpu.dynamic_rotate %1 by %c239_i32 dim 1 : vector<16x256xf32>, i32 -> vector<16x256xf32>
    %40 = vector.extract_strided_slice %0 {offsets = [8, 0], sizes = [1, 256], strides = [1, 1]} : vector<9x256xf32> to vector<1x256xf32>
    %41 = vector.broadcast %40 : vector<1x256xf32> to vector<16x256xf32>
    %42 = arith.mulf %39, %41 : vector<16x256xf32>
    %c128 = arith.constant 128 : index
    %c0_14 = arith.constant 0 : index
    %43 = vector.load %arg8[%c128, %c0_14] : memref<144x256xf32, #tpu.memory_space<vmem>>, vector<16x256xf32>
    tpu.vector_store %arg8[%c128, %c0_14], %42 {strides = array<i32>} : memref<144x256xf32, #tpu.memory_space<vmem>>, vector<16x256xf32>,
    %c0_15 = arith.constant 0 : index
    %c0_16 = arith.constant 0 : index
    %44 = vector.load %arg8[%c0_15, %c0_16] : memref<144x256xf32, #tpu.memory_space<vmem>>, vector<144x256xf32>
    %cst = arith.constant dense<0.000000e+00> : vector<16x256xf32>
    %45 = tpu.matmul %2, %44, %cst {dimension_numbers = #tpu.dot_dimension_numbers<[1], [0], [0], [1], [0, 0, 1, 1], [], []>} : vector<16x144xf32>, vector<144x256xf32>, vector<16x256xf32> -> vector<16x256xf32>
    %c0_17 = arith.constant 0 : index
    %c0_18 = arith.constant 0 : index
    %46 = vector.load %arg4[%c0_17, %c0_18] : memref<16x1xf32, #tpu.memory_space<vmem>>, vector<16x1xf32>
    %47 = vector.broadcast %46 : vector<16x1xf32> to vector<16x256xf32>
    %48 = arith.addf %45, %47 : vector<16x256xf32>
    %cst_19 = arith.constant dense<0.000000e+00> : vector<16xf32>
    %49 = vector.multi_reduction <add>, %48, %cst_19 [1] : vector<16x256xf32> to vector<16xf32>
    %50 = vector.shape_cast %49 : vector<16xf32> to vector<16x1xf32>
    %51 = arith.mulf %48, %48 : vector<16x256xf32>
    %cst_20 = arith.constant dense<0.000000e+00> : vector<16xf32>
    %52 = vector.multi_reduction <add>, %51, %cst_20 [1] : vector<16x256xf32> to vector<16xf32>
    %53 = vector.shape_cast %52 : vector<16xf32> to vector<16x1xf32>
    %cst_21 = arith.constant 3.906250e-03 : f32
    %54 = vector.broadcast %cst_21 : f32 to vector<16x1xf32>
    %55 = arith.mulf %50, %54 : vector<16x1xf32>
    %cst_22 = arith.constant 3.906250e-03 : f32
    %56 = vector.broadcast %cst_22 : f32 to vector<16x1xf32>
    %57 = arith.mulf %53, %56 : vector<16x1xf32>
    %58 = arith.mulf %55, %55 : vector<16x1xf32>
    %59 = arith.subf %57, %58 : vector<16x1xf32>
    %cst_23 = arith.constant 0.000000e+00 : f32
    %60 = vector.broadcast %cst_23 : f32 to vector<16x1xf32>
    %61 = arith.maximumf %59, %60 : vector<16x1xf32>
    %62 = vector.broadcast %55 : vector<16x1xf32> to vector<16x256xf32>
    %63 = arith.subf %48, %62 : vector<16x256xf32>
    %cst_24 = arith.constant 9.99999974E-6 : f32
    %64 = vector.broadcast %cst_24 : f32 to vector<16x1xf32>
    %65 = arith.addf %61, %64 : vector<16x1xf32>
    %66 = math.rsqrt %65 : vector<16x1xf32>
    %67 = vector.broadcast %66 : vector<16x1xf32> to vector<16x256xf32>
    %68 = arith.mulf %63, %67 : vector<16x256xf32>
    %cst_25 = arith.constant 0.000000e+00 : f32
    %69 = vector.broadcast %cst_25 : f32 to vector<16x256xf32>
    %70 = arith.cmpf oge, %68, %69 : vector<16x256xf32>
    %cst_26 = arith.constant 0.00999999977 : f32
    %71 = vector.broadcast %cst_26 : f32 to vector<16x256xf32>
    %72 = arith.mulf %71, %68 : vector<16x256xf32>
    %73 = arith.select %70, %68, %72 : vector<16x256xi1>, vector<16x256xf32>
    %c0_27 = arith.constant 0 : index
    %c0_28 = arith.constant 0 : index
    %74 = vector.load %arg5[%c0_27, %c0_28] : memref<16x144xf32, #tpu.memory_space<vmem>>, vector<16x144xf32>
    %c17_i32_29 = arith.constant 17 : i32
    %75 = tpu.dynamic_rotate %73 by %c17_i32_29 dim 1 : vector<16x256xf32>, i32 -> vector<16x256xf32>
    %76 = vector.extract_strided_slice %0 {offsets = [0, 0], sizes = [1, 256], strides = [1, 1]} : vector<9x256xf32> to vector<1x256xf32>
    %77 = vector.broadcast %76 : vector<1x256xf32> to vector<16x256xf32>
    %78 = arith.mulf %75, %77 : vector<16x256xf32>
    %c0_30 = arith.constant 0 : index
    %c0_31 = arith.constant 0 : index
    %79 = vector.load %arg9[%c0_30, %c0_31] : memref<144x256xf32, #tpu.memory_space<vmem>>, vector<16x256xf32>
    tpu.vector_store %arg9[%c0_30, %c0_31], %78 {strides = array<i32>} : memref<144x256xf32, #tpu.memory_space<vmem>>, vector<16x256xf32>,
    %c16_i32_32 = arith.constant 16 : i32
    %80 = tpu.dynamic_rotate %73 by %c16_i32_32 dim 1 : vector<16x256xf32>, i32 -> vector<16x256xf32>
    %81 = vector.extract_strided_slice %0 {offsets = [1, 0], sizes = [1, 256], strides = [1, 1]} : vector<9x256xf32> to vector<1x256xf32>
    %82 = vector.broadcast %81 : vector<1x256xf32> to vector<16x256xf32>
    %83 = arith.mulf %80, %82 : vector<16x256xf32>
    %c16_33 = arith.constant 16 : index
    %c0_34 = arith.constant 0 : index
    %84 = vector.load %arg9[%c16_33, %c0_34] : memref<144x256xf32, #tpu.memory_space<vmem>>, vector<16x256xf32>
    tpu.vector_store %arg9[%c16_33, %c0_34], %83 {strides = array<i32>} : memref<144x256xf32, #tpu.memory_space<vmem>>, vector<16x256xf32>,
    %c15_i32_35 = arith.constant 15 : i32
    %85 = tpu.dynamic_rotate %73 by %c15_i32_35 dim 1 : vector<16x256xf32>, i32 -> vector<16x256xf32>
    %86 = vector.extract_strided_slice %0 {offsets = [2, 0], sizes = [1, 256], strides = [1, 1]} : vector<9x256xf32> to vector<1x256xf32>
    %87 = vector.broadcast %86 : vector<1x256xf32> to vector<16x256xf32>
    %88 = arith.mulf %85, %87 : vector<16x256xf32>
    %c32_36 = arith.constant 32 : index
    %c0_37 = arith.constant 0 : index
    %89 = vector.load %arg9[%c32_36, %c0_37] : memref<144x256xf32, #tpu.memory_space<vmem>>, vector<16x256xf32>
    tpu.vector_store %arg9[%c32_36, %c0_37], %88 {strides = array<i32>} : memref<144x256xf32, #tpu.memory_space<vmem>>, vector<16x256xf32>,
    %c1_i32_38 = arith.constant 1 : i32
    %90 = tpu.dynamic_rotate %73 by %c1_i32_38 dim 1 : vector<16x256xf32>, i32 -> vector<16x256xf32>
    %91 = vector.extract_strided_slice %0 {offsets = [3, 0], sizes = [1, 256], strides = [1, 1]} : vector<9x256xf32> to vector<1x256xf32>
    %92 = vector.broadcast %91 : vector<1x256xf32> to vector<16x256xf32>
    %93 = arith.mulf %90, %92 : vector<16x256xf32>
    %c48_39 = arith.constant 48 : index
    %c0_40 = arith.constant 0 : index
    %94 = vector.load %arg9[%c48_39, %c0_40] : memref<144x256xf32, #tpu.memory_space<vmem>>, vector<16x256xf32>
    tpu.vector_store %arg9[%c48_39, %c0_40], %93 {strides = array<i32>} : memref<144x256xf32, #tpu.memory_space<vmem>>, vector<16x256xf32>,
    %c64_41 = arith.constant 64 : index
    %c0_42 = arith.constant 0 : index
    %95 = vector.load %arg9[%c64_41, %c0_42] : memref<144x256xf32, #tpu.memory_space<vmem>>, vector<16x256xf32>
    tpu.vector_store %arg9[%c64_41, %c0_42], %73 {strides = array<i32>} : memref<144x256xf32, #tpu.memory_space<vmem>>, vector<16x256xf32>,
    %c255_i32_43 = arith.constant 255 : i32
    %96 = tpu.dynamic_rotate %73 by %c255_i32_43 dim 1 : vector<16x256xf32>, i32 -> vector<16x256xf32>
    %97 = vector.extract_strided_slice %0 {offsets = [5, 0], sizes = [1, 256], strides = [1, 1]} : vector<9x256xf32> to vector<1x256xf32>
    %98 = vector.broadcast %97 : vector<1x256xf32> to vector<16x256xf32>
    %99 = arith.mulf %96, %98 : vector<16x256xf32>
    %c80_44 = arith.constant 80 : index
    %c0_45 = arith.constant 0 : index
    %100 = vector.load %arg9[%c80_44, %c0_45] : memref<144x256xf32, #tpu.memory_space<vmem>>, vector<16x256xf32>
    tpu.vector_store %arg9[%c80_44, %c0_45], %99 {strides = array<i32>} : memref<144x256xf32, #tpu.memory_space<vmem>>, vector<16x256xf32>,
    %c241_i32_46 = arith.constant 241 : i32
    %101 = tpu.dynamic_rotate %73 by %c241_i32_46 dim 1 : vector<16x256xf32>, i32 -> vector<16x256xf32>
    %102 = vector.extract_strided_slice %0 {offsets = [6, 0], sizes = [1, 256], strides = [1, 1]} : vector<9x256xf32> to vector<1x256xf32>
    %103 = vector.broadcast %102 : vector<1x256xf32> to vector<16x256xf32>
    %104 = arith.mulf %101, %103 : vector<16x256xf32>
    %c96_47 = arith.constant 96 : index
    %c0_48 = arith.constant 0 : index
    %105 = vector.load %arg9[%c96_47, %c0_48] : memref<144x256xf32, #tpu.memory_space<vmem>>, vector<16x256xf32>
    tpu.vector_store %arg9[%c96_47, %c0_48], %104 {strides = array<i32>} : memref<144x256xf32, #tpu.memory_space<vmem>>, vector<16x256xf32>,
    %c240_i32_49 = arith.constant 240 : i32
    %106 = tpu.dynamic_rotate %73 by %c240_i32_49 dim 1 : vector<16x256xf32>, i32 -> vector<16x256xf32>
    %107 = vector.extract_strided_slice %0 {offsets = [7, 0], sizes = [1, 256], strides = [1, 1]} : vector<9x256xf32> to vector<1x256xf32>
    %108 = vector.broadcast %107 : vector<1x256xf32> to vector<16x256xf32>
    %109 = arith.mulf %106, %108 : vector<16x256xf32>
    %c112_50 = arith.constant 112 : index
    %c0_51 = arith.constant 0 : index
    %110 = vector.load %arg9[%c112_50, %c0_51] : memref<144x256xf32, #tpu.memory_space<vmem>>, vector<16x256xf32>
    tpu.vector_store %arg9[%c112_50, %c0_51], %109 {strides = array<i32>} : memref<144x256xf32, #tpu.memory_space<vmem>>, vector<16x256xf32>,
    %c239_i32_52 = arith.constant 239 : i32
    %111 = tpu.dynamic_rotate %73 by %c239_i32_52 dim 1 : vector<16x256xf32>, i32 -> vector<16x256xf32>
    %112 = vector.extract_strided_slice %0 {offsets = [8, 0], sizes = [1, 256], strides = [1, 1]} : vector<9x256xf32> to vector<1x256xf32>
    %113 = vector.broadcast %112 : vector<1x256xf32> to vector<16x256xf32>
    %114 = arith.mulf %111, %113 : vector<16x256xf32>
    %c128_53 = arith.constant 128 : index
    %c0_54 = arith.constant 0 : index
    %115 = vector.load %arg9[%c128_53, %c0_54] : memref<144x256xf32, #tpu.memory_space<vmem>>, vector<16x256xf32>
    tpu.vector_store %arg9[%c128_53, %c0_54], %114 {strides = array<i32>} : memref<144x256xf32, #tpu.memory_space<vmem>>, vector<16x256xf32>,
    %c0_55 = arith.constant 0 : index
    %c0_56 = arith.constant 0 : index
    %116 = vector.load %arg9[%c0_55, %c0_56] : memref<144x256xf32, #tpu.memory_space<vmem>>, vector<144x256xf32>
    %cst_57 = arith.constant dense<0.000000e+00> : vector<16x256xf32>
    %117 = tpu.matmul %74, %116, %cst_57 {dimension_numbers = #tpu.dot_dimension_numbers<[1], [0], [0], [1], [0, 0, 1, 1], [], []>} : vector<16x144xf32>, vector<144x256xf32>, vector<16x256xf32> -> vector<16x256xf32>
    %c0_58 = arith.constant 0 : index
    %c0_59 = arith.constant 0 : index
    %118 = vector.load %arg6[%c0_58, %c0_59] : memref<16x1xf32, #tpu.memory_space<vmem>>, vector<16x1xf32>
    %119 = vector.broadcast %118 : vector<16x1xf32> to vector<16x256xf32>
    %120 = arith.addf %117, %119 : vector<16x256xf32>
    %cst_60 = arith.constant dense<0.000000e+00> : vector<16xf32>
    %121 = vector.multi_reduction <add>, %120, %cst_60 [1] : vector<16x256xf32> to vector<16xf32>
    %122 = vector.shape_cast %121 : vector<16xf32> to vector<16x1xf32>
    %123 = arith.mulf %120, %120 : vector<16x256xf32>
    %cst_61 = arith.constant dense<0.000000e+00> : vector<16xf32>
    %124 = vector.multi_reduction <add>, %123, %cst_61 [1] : vector<16x256xf32> to vector<16xf32>
    %125 = vector.shape_cast %124 : vector<16xf32> to vector<16x1xf32>
    %cst_62 = arith.constant 3.906250e-03 : f32
    %126 = vector.broadcast %cst_62 : f32 to vector<16x1xf32>
    %127 = arith.mulf %122, %126 : vector<16x1xf32>
    %cst_63 = arith.constant 3.906250e-03 : f32
    %128 = vector.broadcast %cst_63 : f32 to vector<16x1xf32>
    %129 = arith.mulf %125, %128 : vector<16x1xf32>
    %130 = arith.mulf %127, %127 : vector<16x1xf32>
    %131 = arith.subf %129, %130 : vector<16x1xf32>
    %cst_64 = arith.constant 0.000000e+00 : f32
    %132 = vector.broadcast %cst_64 : f32 to vector<16x1xf32>
    %133 = arith.maximumf %131, %132 : vector<16x1xf32>
    %134 = vector.broadcast %127 : vector<16x1xf32> to vector<16x256xf32>
    %135 = arith.subf %120, %134 : vector<16x256xf32>
    %cst_65 = arith.constant 9.99999974E-6 : f32
    %136 = vector.broadcast %cst_65 : f32 to vector<16x1xf32>
    %137 = arith.addf %133, %136 : vector<16x1xf32>
    %138 = math.rsqrt %137 : vector<16x1xf32>
    %139 = vector.broadcast %138 : vector<16x1xf32> to vector<16x256xf32>
    %140 = arith.mulf %135, %139 : vector<16x256xf32>
    %cst_66 = arith.constant 0.000000e+00 : f32
    %141 = vector.broadcast %cst_66 : f32 to vector<16x256xf32>
    %142 = arith.cmpf oge, %140, %141 : vector<16x256xf32>
    %cst_67 = arith.constant 0.00999999977 : f32
    %143 = vector.broadcast %cst_67 : f32 to vector<16x256xf32>
    %144 = arith.mulf %143, %140 : vector<16x256xf32>
    %145 = arith.select %142, %140, %144 : vector<16x256xi1>, vector<16x256xf32>
    %c0_68 = arith.constant 0 : index
    %c0_69 = arith.constant 0 : index
    %146 = vector.load %arg7[%c0_68, %c0_69] : memref<16x256xf32, #tpu.memory_space<vmem>>, vector<16x256xf32>
    tpu.vector_store %arg7[%c0_68, %c0_69], %145 {strides = array<i32>} : memref<16x256xf32, #tpu.memory_space<vmem>>, vector<16x256xf32>,
    return
  }
  func.func @transform_0(%arg0: i32) -> (i32, i32) {
    %c0_i32 = arith.constant 0 : i32
    %c0_i32_0 = arith.constant 0 : i32
    return %arg0, %c0_i32 : i32, i32
  }
  func.func @transform_1(%arg0: i32) -> (i32, i32) {
    %c0_i32 = arith.constant 0 : i32
    %c0_i32_0 = arith.constant 0 : i32
    %c0_i32_1 = arith.constant 0 : i32
    return %c0_i32, %c0_i32_0 : i32, i32
  }
  func.func @transform_2(%arg0: i32) -> (i32, i32) {
    %c0_i32 = arith.constant 0 : i32
    %c0_i32_0 = arith.constant 0 : i32
    %c0_i32_1 = arith.constant 0 : i32
    return %c0_i32, %c0_i32_0 : i32, i32
  }
  func.func @transform_3(%arg0: i32) -> (i32, i32) {
    %c0_i32 = arith.constant 0 : i32
    %c0_i32_0 = arith.constant 0 : i32
    %c0_i32_1 = arith.constant 0 : i32
    return %c0_i32, %c0_i32_0 : i32, i32
  }
  func.func @transform_4(%arg0: i32) -> (i32, i32) {
    %c0_i32 = arith.constant 0 : i32
    %c0_i32_0 = arith.constant 0 : i32
    %c0_i32_1 = arith.constant 0 : i32
    return %c0_i32, %c0_i32_0 : i32, i32
  }
  func.func @transform_5(%arg0: i32) -> (i32, i32) {
    %c0_i32 = arith.constant 0 : i32
    %c0_i32_0 = arith.constant 0 : i32
    %c0_i32_1 = arith.constant 0 : i32
    return %c0_i32, %c0_i32_0 : i32, i32
  }
  func.func @transform_6(%arg0: i32) -> (i32, i32) {
    %c0_i32 = arith.constant 0 : i32
    %c0_i32_0 = arith.constant 0 : i32
    return %arg0, %c0_i32 : i32, i32
  }
}

</mosaic_0001>

<bundles_post_ra>
// kernel: tpu_custom_call.1
= control target key start
LH: loop header
LB: loop body
LE: loop exit
PB: predicated region body
PF: predicated region fallthrough
CT: control target
= control target key end

     0   :  { %11 = vsyncpa [#allocation5], 0  ;;  %s1633_s0 = inlined_call_operand.vmem [shape: f32[16,256], index: 0, kind: input, shape index: {}]   ;;  %s1634_s1 = inlined_call_operand.hbm [shape: f32[9,256], index: 1, kind: input, shape index: {}]   ;;  %s1635_s2 = inlined_call_operand.hbm [shape: f32[16,144], index: 2, kind: input, shape index: {}]   ;;  %s1636_s3 = inlined_call_operand.vmem [shape: f32[16,1], index: 3, kind: input, shape index: {}]   ;;  %s1637_s4 = inlined_call_operand.hbm [shape: f32[16,144], index: 4, kind: input, shape index: {}]   ;;  %s1638_s5 = inlined_call_operand.vmem [shape: f32[16,1], index: 5, kind: input, shape index: {}]   ;;  %s1639_s6 = inlined_call_operand.hbm [shape: f32[16,256], index: 6, kind: output, shape index: {}]  }
   0x1   :  { %12 = vsyncpa [#allocation8], 0 }
   0x2   :  { %13 = vsyncpa [#allocation6], 0  ;;  %s1064_s21 = smov [#allocation7]   ;;  %s1065_s23 = smov [#allocation4]  }
   0x3   :  { %s33_s22 = sshll.u32 %s1064_s21, 4  ;;  %s21_s24 = sshll.u32 %s1065_s23, 4  ;;  %s34_s22 = int_to_ptr.vmem [resolvable:$true] %s33_s22  ;;  %s1113_s24 = int_to_ptr.vmem [resolvable:$true] %s21_s24 }
   0x4   :  { %s970_s27 = scalar_lea.hbm %s1635_s2, 512 }
   0x5   :  { %p971_p0 = scmp.ne.s32.totalorder %s1635_s2, %s970_s27  ;;  %p974_p1 = scmp.lt.u32.totalorder %s970_s27, %s1635_s2 }
   0x7   :  { %p976_p2 = pnand %p974_p1, %p971_p0 }
   0x9   :  { %979 = shalt.err (!%p976_p2)
}
   0xa   :  { %s980_s8 = scalar_lea.vmem %s34_s22, 512  ;;  %p985_p4 = scmp.lt.s32.totalorder %s34_s22, %s34_s22 }
   0xb   :  { %p981_p3 = scmp.ne.s32.totalorder %s34_s22, %s980_s8  ;;  %p986_p5 = scmp.lt.s32.totalorder %s980_s8, %s980_s8 }
   0xd   :  { %p987_p6 = por %p986_p5, %p985_p4 }
   0xf   :  { %p988_p7 = pnand %p987_p6, %p981_p3 }
  0x11   :  { %991 = shalt.err (!%p988_p7)
}
  0x12   :  { %s1066_s9 = smov 256   ;;  %s1067_s10 = smov 16  }
  0x13   :  { %39 = dma.hbm_to_vmem [thread:$0]  %s1635_s2, 512, %s34_s22, [#allocation8], %s1066_s9, %s1066_s9, %s1067_s10  }
  0x14   :  { %s992_s15 = scalar_lea.hbm %s1634_s1, 512 }
  0x15   :  { %p993_p8 = scmp.ne.s32.totalorder %s1634_s1, %s992_s15  ;;  %p996_p9 = scmp.lt.u32.totalorder %s992_s15, %s1634_s1 }
  0x17   :  { %p998_p10 = pnand %p996_p9, %p993_p8 }
  0x19   :  { %1001 = shalt.err (!%p998_p10)
}
  0x1a   :  { %s1002_s20 = scalar_lea.vmem %s1113_s24, 512  ;;  %p1007_p12 = scmp.lt.s32.totalorder %s1113_s24, %s1113_s24 }
  0x1b   :  { %p1003_p11 = scmp.ne.s32.totalorder %s1113_s24, %s1002_s20  ;;  %p1008_p13 = scmp.lt.s32.totalorder %s1002_s20, %s1002_s20 }
  0x1d   :  { %p1009_p0 = por %p1008_p13, %p1007_p12 }
  0x1f   :  { %p1010_p1 = pnand %p1009_p0, %p1003_p11 }
  0x21   :  { %1013 = shalt.err (!%p1010_p1)
}
  0x22   :  { %27 = dma.hbm_to_vmem [thread:$0]  %s1634_s1, 512, %s1113_s24, [#allocation5], %s1066_s9, %s1066_s9, %s1067_s10  }
  0x23   :  { %s1068_s22 = smov [#allocation9]   ;;  %s1014_s27 = scalar_lea.hbm %s1637_s4, 512 }
  0x24   :  { %s47_s23 = sshll.u32 %s1068_s22, 4  ;;  %p1015_p2 = scmp.ne.s32.totalorder %s1637_s4, %s1014_s27  ;;  %s48_s23 = int_to_ptr.vmem [resolvable:$true] %s47_s23 }
  0x25   :  { %p1018_p3 = scmp.lt.u32.totalorder %s1014_s27, %s1637_s4 }
  0x27   :  { %p1020_p4 = pnand %p1018_p3, %p1015_p2 }
  0x29   :  { %1023 = shalt.err (!%p1020_p4)
}
  0x2a   :  { %s1024_s8 = scalar_lea.vmem %s48_s23, 512  ;;  %p1029_p6 = scmp.lt.s32.totalorder %s48_s23, %s48_s23 }
  0x2b   :  { %p1025_p5 = scmp.ne.s32.totalorder %s48_s23, %s1024_s8  ;;  %p1030_p7 = scmp.lt.s32.totalorder %s1024_s8, %s1024_s8 }
  0x2d   :  { %p1031_p8 = por %p1030_p7, %p1029_p6 }
  0x2f   :  { %p1032_p9 = pnand %p1031_p8, %p1025_p5 }
  0x31   :  { %1035 = shalt.err (!%p1032_p9)
}
  0x32   :  { %53 = dma.hbm_to_vmem [thread:$0]  %s1637_s4, 512, %s48_s23, [#allocation8], %s1066_s9, %s1066_s9, %s1067_s10  }
  0x33   :  { %1058 = dma.done.wait [#allocation5], 512  }
  0x34   :  { %1059 = vsyncadd [#allocation5], 4294966784 }
  0x35   :  { %1060 = dma.done.wait [#allocation8], 1024  }
  0x36   :  { %1061 = vsyncadd [#allocation8], 4294966272  ;;  %v1168_v0 = vld [vmem:[%s1633_s0 + $0x8] sm:$0xff]  ;;  %v1173_v1 = vld [vmem:[%s1633_s0] sm:$0xff]  ;;  %s1069_s15 = smov 17   ;;  %s1071_s19 = smov 1   ;;  %v85_v10 = vlaneseq }
  0x37   :  { %81 = vrot.lane.b32.xlu1 %v1168_v0, %s1069_s15  ;;  %77 = vrot.lane.b32.xlu0 %v1173_v1, %s1069_s15  ;;  %v1182_v2 = vld [vmem:[%s1633_s0 + $0x18] sm:$0xff]  ;;  %v1187_v3 = vld [vmem:[%s1633_s0 + $0x10] sm:$0xff]  ;;  %s1070_s0 = smov 15   ;;  %s1072_s20 = smov 127   ;;  %v74_v6 = vld [vmem:[#allocation7 + $0x8] sm:$0xff]  ;;  %vm363_vm0 = vcmask 130048  }
  0x38   :  { %v890_v4 = vpack.c.bf16 %v1182_v2, %v1168_v0  ;;  %v892_v5 = vpack.c.bf16 %v1187_v3, %v1173_v1  ;;  %s1073_s2 = smov 113   ;;  %s1074_s21 = smov 112   ;;  %870 = vmatprep.mubr.msk.f32.mxu0 %vm363_vm0, %v74_v6  ;;  %v1076_v7 = vmov 0   ;;  %v351_v8 = vld [vmem:[%s1636_s3] sm:$0xff]  ;;  %v352_v9 = vld [vmem:[%s1636_s3 + $0x8] sm:$0xff]  ;;  %v1260_v11 = vshrl.u32 %v85_v10, 7 }
  0x39   :  { %s1075_s22 = smov 111   ;;  %960 = vset.pattern.permute.xlu0 %v1076_v7  ;;  %961 = vset.pattern.permute.xlu1 %v1076_v7  ;;  %v1262_v12 = vand.u32 127, %v85_v10  ;;  %v1265_v14 = vld [vmem:[#allocation4] sm:$0xff]  ;;  %v1267_v15 = vld [vmem:[#allocation4 + $0x8] sm:$0xff] }
  0x3a   :  { %v94_v13 = vsub.s32 0, %v1260_v11  ;;  %v123_v26 = vsub.s32 1, %v1260_v11  ;;  %v152_v39 = vsub.s32 2, %v1260_v11  ;;  %v181_v56 = vsub.s32 3, %v1260_v11 }
  0x3b   :  { %83 = vrot.lane.b32.xlu1 %v1182_v2, %s1069_s15  ;;  %79 = vrot.lane.b32.xlu0 %v1187_v3, %s1069_s15  ;;  %vm87_vm1 = vcmp.lt.s32.totalorder %v1262_v12, 17  ;;  %vm116_vm2 = vcmp.lt.s32.totalorder %v1262_v12, 16  ;;  %vm145_vm3 = vcmp.lt.s32.totalorder %v1262_v12, 15  ;;  %vm174_vm4 = vcmp.lt.s32.totalorder %v1262_v12, 1 }
  0x3c   :  { %v1271_v18 = vrot.slane %v1265_v14, %v94_v13  ;;  %v1274_v19 = vrot.slane %v1267_v15, %v94_v13  ;;  %v1291_v35 = vrot.slane %v1265_v14, %v123_v26  ;;  %v1294_v36 = vrot.slane %v1267_v15, %v123_v26 }
  0x3d   :  { %v1311_v52 = vrot.slane %v1265_v14, %v152_v39  ;;  %v1314_v53 = vrot.slane %v1267_v15, %v152_v39  ;;  %v1331_v13 = vrot.slane %v1265_v14, %v181_v56  ;;  %vm207_vm5 = vcmp.lt.s32.totalorder %v1262_v12, 127 }
  0x3e   :  { %vm236_vm6 = vcmp.lt.s32.totalorder %v1262_v12, 113  ;;  %vm265_vm7 = vcmp.lt.s32.totalorder %v1262_v12, 112  ;;  %vm294_vm8 = vcmp.lt.s32.totalorder %v1262_v12, 111  ;;  %v499_v12 = vld [vmem:[#allocation9 + $0x10] sm:$0xff] }
  0x3f   :  { %110 = vrot.lane.b32.xlu1 %v1187_v3, %s1067_s10  ;;  %108 = vrot.lane.b32.xlu0 %v1173_v1, %s1067_s10 }
  0x43   :  { %114 = vrot.lane.b32.xlu1 %v1182_v2, %s1067_s10  ;;  %112 = vrot.lane.b32.xlu0 %v1168_v0, %s1067_s10 }
  0x47   :  { %139 = vrot.lane.b32.xlu1 %v1187_v3, %s1070_s0  ;;  %137 = vrot.lane.b32.xlu0 %v1173_v1, %s1070_s0 }
  0x4b   :  { %143 = vrot.lane.b32.xlu1 %v1182_v2, %s1070_s0  ;;  %141 = vrot.lane.b32.xlu0 %v1168_v0, %s1070_s0 }
  0x4f   :  { %168 = vrot.lane.b32.xlu1 %v1187_v3, %s1071_s19  ;;  %166 = vrot.lane.b32.xlu0 %v1173_v1, %s1071_s19 }
  0x53   :  { %172 = vrot.lane.b32.xlu1 %v1182_v2, %s1071_s19  ;;  %170 = vrot.lane.b32.xlu0 %v1168_v0, %s1071_s19 }
  0x57   :  { %201 = vrot.lane.b32.xlu1 %v1187_v3, %s1072_s20  ;;  %199 = vrot.lane.b32.xlu0 %v1173_v1, %s1072_s20 }
  0x5b   :  { %205 = vrot.lane.b32.xlu1 %v1182_v2, %s1072_s20  ;;  %203 = vrot.lane.b32.xlu0 %v1168_v0, %s1072_s20 }
  0x5f   :  { %230 = vrot.lane.b32.xlu1 %v1187_v3, %s1073_s2  ;;  %228 = vrot.lane.b32.xlu0 %v1173_v1, %s1073_s2 }
  0x63   :  { %234 = vrot.lane.b32.xlu1 %v1182_v2, %s1073_s2  ;;  %232 = vrot.lane.b32.xlu0 %v1168_v0, %s1073_s2 }
  0x67   :  { %259 = vrot.lane.b32.xlu1 %v1187_v3, %s1074_s21  ;;  %257 = vrot.lane.b32.xlu0 %v1173_v1, %s1074_s21 }
  0x6b   :  { %263 = vrot.lane.b32.xlu1 %v1182_v2, %s1074_s21  ;;  %261 = vrot.lane.b32.xlu0 %v1168_v0, %s1074_s21 }
  0x6f   :  { %288 = vrot.lane.b32.xlu1 %v1187_v3, %s1075_s22  ;;  %286 = vrot.lane.b32.xlu0 %v1173_v1, %s1075_s22 }
  0x73   :  { %292 = vrot.lane.b32.xlu1 %v1182_v2, %s1075_s22  ;;  %290 = vrot.lane.b32.xlu0 %v1168_v0, %s1075_s22 }
  0x77   :  { %355 = vperm.xlu0 %960, %v351_v8   ;;  %360 = vperm.xlu1 %961, %v352_v9  }
  0xa9   :  { %v82_v16 = vpop.permute.xlu1 %81  ;;  %v78_v17 = vpop.permute.xlu0 %77 }
  0xaa   :  { %v88_v20 = vsel %vm87_vm1, %v78_v17, %v82_v16  ;;  %v90_v21 = vsel %vm87_vm1, %v82_v16, %v78_v17  ;;  %v1334_v16 = vrot.slane %v1267_v15, %v181_v56  ;;  %v272_v56 = vsub.s32 7, %v1260_v11 }
  0xab   :  { %v100_v27 = vmul.f32 %v1271_v18, %v90_v21  ;;  %v101_v29 = vmul.f32 %v1274_v19, %v88_v20  ;;  %v214_v21 = vsub.s32 5, %v1260_v11 }
  0xad   :  { %v84_v22 = vpop.permute.xlu1 %83  ;;  %v80_v23 = vpop.permute.xlu0 %79 }
  0xae   :  { %v89_v24 = vsel %vm87_vm1, %v80_v23, %v84_v22  ;;  %v91_v25 = vsel %vm87_vm1, %v84_v22, %v80_v23 }
  0xaf   :  { %v102_v28 = vmul.f32 %v1271_v18, %v91_v25  ;;  %v103_v30 = vmul.f32 %v1274_v19, %v89_v24 }
  0xb1   :  { %v111_v31 = vpop.permute.xlu1 %110  ;;  %v109_v32 = vpop.permute.xlu0 %108  ;;  %v874_v33 = vpack.c.bf16 %v103_v30, %v101_v29  ;;  %v876_v34 = vpack.c.bf16 %v102_v28, %v100_v27 }
  0xb3   :  { %875 = vmatprep.subr.bf16.mxu0 %v874_v33 }
  0xb4   :  { %877 = vmatpush1.bf16.msra.mxu0 %v876_v34  ;;  %v1351_v34 = vrot.slane %v1265_v14, %v214_v21 }
  0xb5   :  { %v115_v37 = vpop.permute.xlu1 %114  ;;  %v113_v38 = vpop.permute.xlu0 %112 }
  0xb6   :  { %v118_v40 = vsel %vm116_vm2, %v111_v31, %v115_v37  ;;  %v120_v41 = vsel %vm116_vm2, %v115_v37, %v111_v31  ;;  %v117_v42 = vsel %vm116_vm2, %v109_v32, %v113_v38  ;;  %v119_v43 = vsel %vm116_vm2, %v113_v38, %v109_v32 }
  0xb7   :  { %v131_v44 = vmul.f32 %v1291_v35, %v120_v41  ;;  %v132_v45 = vmul.f32 %v1294_v36, %v118_v40  ;;  %v129_v46 = vmul.f32 %v1291_v35, %v119_v43  ;;  %v130_v47 = vmul.f32 %v1294_v36, %v117_v42 }
  0xb8   :  { %v1354_v37 = vrot.slane %v1267_v15, %v214_v21  ;;  %v243_v40 = vsub.s32 6, %v1260_v11 }
  0xb9   :  { %v140_v48 = vpop.permute.xlu1 %139  ;;  %v138_v49 = vpop.permute.xlu0 %137  ;;  %v878_v50 = vpack.c.bf16 %v132_v45, %v130_v47  ;;  %v880_v51 = vpack.c.bf16 %v131_v44, %v129_v46 }
  0xbb   :  { %879 = vmatprep.subr.bf16.mxu0 %v878_v50  ;;  %v1377_v50 = vrot.slane %v1265_v14, %v243_v40 }
  0xbc   :  { %881 = vmatpush1.bf16.msra.mxu0 %v880_v51  ;;  %v1380_v51 = vrot.slane %v1267_v15, %v243_v40 }
  0xbd   :  { %v144_v54 = vpop.permute.xlu1 %143  ;;  %v142_v55 = vpop.permute.xlu0 %141 }
  0xbe   :  { %v147_v57 = vsel %vm145_vm3, %v140_v48, %v144_v54  ;;  %v149_v58 = vsel %vm145_vm3, %v144_v54, %v140_v48  ;;  %v146_v59 = vsel %vm145_vm3, %v138_v49, %v142_v55  ;;  %v148_v60 = vsel %vm145_vm3, %v142_v55, %v138_v49 }
  0xbf   :  { %v160_v61 = vmul.f32 %v1311_v52, %v149_v58  ;;  %v161_v62 = vmul.f32 %v1314_v53, %v147_v57  ;;  %v158_v63 = vmul.f32 %v1311_v52, %v148_v60  ;;  %v159_v6 = vmul.f32 %v1314_v53, %v146_v59 }
  0xc1   :  { %v169_v7 = vpop.permute.xlu1 %168  ;;  %v167_v8 = vpop.permute.xlu0 %166  ;;  %v882_v9 = vpack.c.bf16 %v161_v62, %v159_v6  ;;  %v884_v10 = vpack.c.bf16 %v160_v61, %v158_v63 }
  0xc3   :  { %883 = vmatprep.subr.bf16.mxu0 %v882_v9 }
  0xc4   :  { %885 = vmatpush1.bf16.msra.mxu0 %v884_v10 }
  0xc5   :  { %v173_v17 = vpop.permute.xlu1 %172  ;;  %v171_v20 = vpop.permute.xlu0 %170 }
  0xc6   :  { %v176_v22 = vsel %vm174_vm4, %v169_v7, %v173_v17  ;;  %v178_v23 = vsel %vm174_vm4, %v173_v17, %v169_v7  ;;  %v175_v24 = vsel %vm174_vm4, %v167_v8, %v171_v20  ;;  %v177_v25 = vsel %vm174_vm4, %v171_v20, %v167_v8 }
  0xc7   :  { %v189_v26 = vmul.f32 %v1331_v13, %v178_v23  ;;  %v190_v27 = vmul.f32 %v1334_v16, %v176_v22  ;;  %v187_v28 = vmul.f32 %v1331_v13, %v177_v25  ;;  %v188_v29 = vmul.f32 %v1334_v16, %v175_v24 }
  0xc8   :  { %v1397_v7 = vrot.slane %v1265_v14, %v272_v56  ;;  %v1400_v8 = vrot.slane %v1267_v15, %v272_v56 }
  0xc9   :  { %v202_v30 = vpop.permute.xlu1 %201  ;;  %v200_v31 = vpop.permute.xlu0 %199  ;;  %v886_v32 = vpack.c.bf16 %v190_v27, %v188_v29  ;;  %v888_v33 = vpack.c.bf16 %v189_v26, %v187_v28  ;;  %v1415_v29 = vld [vmem:[#allocation4 + $0x10] ss:$0 sm:$0xff] }
  0xcb   :  { %887 = vmatprep.subr.bf16.mxu0 %v886_v32 }
  0xcc   :  { %889 = vmatpush1.bf16.msra.mxu0 %v888_v33 }
  0xcd   :  { %v206_v38 = vpop.permute.xlu1 %205  ;;  %v204_v39 = vpop.permute.xlu0 %203  ;;  %891 = vmatprep.subr.bf16.mxu0 %v890_v4 }
  0xce   :  { %v209_v41 = vsel %vm207_vm5, %v202_v30, %v206_v38  ;;  %v211_v42 = vsel %vm207_vm5, %v206_v38, %v202_v30  ;;  %v208_v43 = vsel %vm207_vm5, %v200_v31, %v204_v39  ;;  %v210_v44 = vsel %vm207_vm5, %v204_v39, %v200_v31  ;;  %v1417_v30 = vld [vmem:[#allocation4 + $0x18] ss:$0 sm:$0xff] }
  0xcf   :  { %v222_v45 = vmul.f32 %v1351_v34, %v209_v41  ;;  %v223_v46 = vmul.f32 %v1354_v37, %v211_v42  ;;  %v220_v0 = vmul.f32 %v1351_v34, %v208_v43  ;;  %v221_v2 = vmul.f32 %v1354_v37, %v210_v44 }
  0xd0   :  { %893 = vmatpush1.bf16.msra.mxu0 %v892_v5 }
  0xd1   :  { %v231_v4 = vpop.permute.xlu1 %230  ;;  %v229_v47 = vpop.permute.xlu0 %228  ;;  %v894_v48 = vpack.c.bf16 %v223_v46, %v221_v2  ;;  %v896_v49 = vpack.c.bf16 %v222_v45, %v220_v0  ;;  %v73_v0 = vld [vmem:[#allocation7] sm:$0xff]  ;;  %v76_v2 = vld [vmem:[#allocation7 + $0x18] sm:$0xff] }
  0xd3   :  { %895 = vmatprep.subr.bf16.mxu0 %v894_v48 }
  0xd4   :  { %897 = vmatpush1.bf16.msra.mxu0 %v896_v49 }
  0xd5   :  { %v235_v54 = vpop.permute.xlu1 %234  ;;  %v233_v55 = vpop.permute.xlu0 %232 }
  0xd6   :  { %v238_v1 = vsel %vm236_vm6, %v231_v4, %v235_v54  ;;  %v240_v3 = vsel %vm236_vm6, %v235_v54, %v231_v4  ;;  %v237_v5 = vsel %vm236_vm6, %v229_v47, %v233_v55  ;;  %v239_v57 = vsel %vm236_vm6, %v233_v55, %v229_v47  ;;  %v75_v4 = vld [vmem:[#allocation7 + $0x10] sm:$0xff] }
  0xd7   :  { %v251_v58 = vmul.f32 %v1377_v50, %v238_v1  ;;  %v252_v59 = vmul.f32 %v1380_v51, %v240_v3  ;;  %v249_v60 = vmul.f32 %v1377_v50, %v237_v5  ;;  %v250_v11 = vmul.f32 %v1380_v51, %v239_v57 }
  0xd9   :  { %v260_v61 = vpop.permute.xlu1 %259  ;;  %v258_v62 = vpop.permute.xlu0 %257  ;;  %v898_v63 = vpack.c.bf16 %v252_v59, %v250_v11  ;;  %v900_v6 = vpack.c.bf16 %v251_v58, %v249_v60 }
  0xdb   :  { %899 = vmatprep.subr.bf16.mxu0 %v898_v63 }
  0xdc   :  { %901 = vmatpush1.bf16.msra.mxu0 %v900_v6 }
  0xdd   :  { %v264_v9 = vpop.permute.xlu1 %263  ;;  %v262_v10 = vpop.permute.xlu0 %261 }
  0xde   :  { %v267_v17 = vsel %vm265_vm7, %v260_v61, %v264_v9  ;;  %v269_v20 = vsel %vm265_vm7, %v264_v9, %v260_v61  ;;  %v266_v21 = vsel %vm265_vm7, %v258_v62, %v262_v10  ;;  %v268_v22 = vsel %vm265_vm7, %v262_v10, %v258_v62 }
  0xdf   :  { %v280_v14 = vmul.f32 %v1397_v7, %v267_v17  ;;  %v281_v15 = vmul.f32 %v1400_v8, %v269_v20  ;;  %v278_v23 = vmul.f32 %v1397_v7, %v266_v21  ;;  %v279_v24 = vmul.f32 %v1400_v8, %v268_v22 }
  0xe1   :  { %v289_v25 = vpop.permute.xlu1 %288  ;;  %v287_v26 = vpop.permute.xlu0 %286  ;;  %v902_v27 = vpack.c.bf16 %v281_v15, %v279_v24  ;;  %v904_v28 = vpack.c.bf16 %v280_v14, %v278_v23 }
  0xe3   :  { %903 = vmatprep.subr.bf16.mxu0 %v902_v27 }
  0xe4   :  { %905 = vmatpush1.bf16.msra.mxu0 %v904_v28 }
  0xe5   :  { %v293_v31 = vpop.permute.xlu1 %292  ;;  %v291_v32 = vpop.permute.xlu0 %290 }
  0xe6   :  { %v296_v33 = vsel %vm294_vm8, %v289_v25, %v293_v31  ;;  %v298_v38 = vsel %vm294_vm8, %v293_v31, %v289_v25  ;;  %v295_v39 = vsel %vm294_vm8, %v287_v26, %v291_v32  ;;  %v297_v40 = vsel %vm294_vm8, %v291_v32, %v287_v26 }
  0xe7   :  { %v309_v41 = vmul.f32 %v1415_v29, %v296_v33  ;;  %v310_v42 = vmul.f32 %v1417_v30, %v298_v38  ;;  %v307_v43 = vmul.f32 %v1415_v29, %v295_v39  ;;  %v308_v44 = vmul.f32 %v1417_v30, %v297_v40 }
  0xe9   :  { %v906_v45 = vpack.c.bf16 %v310_v42, %v308_v44  ;;  %v908_v46 = vpack.c.bf16 %v309_v41, %v307_v43 }
  0xeb   :  { %907 = vmatprep.subr.bf16.mxu0 %v906_v45 }
  0xec   :  { %909 = vmatpush1.bf16.msra.mxu0 %v908_v46 }
  0xef   :  { %435 = vmatmul.mubr.f32.vlgmr.msra.gmra.mrb[0].mxu0 %v73_v0 }
  0xf0   :  { %871 = vmatprep.mubr.msk.f32.mxu0 %vm363_vm0, %v76_v2 }
  0xf3   :  { %441 = vmatmul.mubr.f32.gmra.mrb[2].mxu0 %v75_v4 }
  0xf6   :  { %v356_v47 = vpop.permute.xlu0 %355  ;;  %v361_v56 = vpop.permute.xlu1 %360 }
 0x1c2   :  { %v436_v48 = vpop.f32.mrb[0].mxu0 }
 0x1c3   :  { %v437_v49 = vadd.f32 %v436_v48, %v356_v47  ;;  %v438_v54 = vpop.f32.mrb[1].mxu0 }
 0x1c4   :  { %v439_v55 = vadd.f32 %v438_v54, %v356_v47 }
 0x1c5   :  { %v453_v61 = vmul.f32 %v437_v49, %v437_v49 }
 0x1c6   :  { %v442_v1 = vpop.f32.mrb[2].mxu0  ;;  %v447_v3 = vadd.f32 %v439_v55, %v437_v49  ;;  %v454_v62 = vmul.f32 %v439_v55, %v439_v55 }
 0x1c7   :  { %v443_v5 = vadd.f32 %v442_v1, %v361_v56  ;;  %v444_v57 = vpop.f32.mrb[3].mxu0 }
 0x1c8   :  { %v445_v58 = vadd.f32 %v444_v57, %v361_v56  ;;  %448 = vadd.xlane.f32.xlu1 %v447_v3  ;;  %v457_v6 = vadd.f32 %v454_v62, %v453_v61  ;;  %v498_v3 = vld [vmem:[#allocation9 + $0x8] sm:$0xff]  ;;  %v701_v57 = vld [vmem:[%s1638_s5] sm:$0xff] }
 0x1c9   :  { %v455_v59 = vmul.f32 %v443_v5, %v443_v5  ;;  %872 = vmatprep.mubr.msk.f32.mxu1 %vm363_vm0, %v498_v3 }
 0x1ca   :  { %v450_v60 = vadd.f32 %v445_v58, %v443_v5  ;;  %v456_v11 = vmul.f32 %v445_v58, %v445_v58 }
 0x1cc   :  { %451 = vadd.xlane.f32.xlu0 %v450_v60  ;;  %v460_v63 = vadd.f32 %v456_v11, %v455_v59 }
 0x1ce   :  { %461 = vadd.xlane.f32.xlu1 %v460_v63 }
 0x1d0   :  { %458 = vadd.xlane.f32.xlu0 %v457_v6 }
 0x255   :  { %v449_v9 = vpop.xlane.xlu1 %448 }
 0x256   :  { %v463_v17 = vmul.f32 0.00390625, %v449_v9 }
 0x258   :  { %v467_v25 = vmul.f32 %v463_v17, %v463_v17  ;;  %v473_v43 = vsub.f32 %v437_v49, %v463_v17  ;;  %v474_v44 = vsub.f32 %v439_v55, %v463_v17 }
 0x259   :  { %v452_v10 = vpop.xlane.xlu0 %451 }
 0x25a   :  { %v464_v20 = vmul.f32 0.00390625, %v452_v10 }
 0x25b   :  { %v462_v21 = vpop.xlane.xlu1 %461 }
 0x25c   :  { %v468_v22 = vmul.f32 %v464_v20, %v464_v20  ;;  %v466_v14 = vmul.f32 0.00390625, %v462_v21  ;;  %v475_v33 = vsub.f32 %v443_v5, %v464_v20  ;;  %v476_v38 = vsub.f32 %v445_v58, %v464_v20  ;;  %v702_v5 = vld [vmem:[%s1638_s5 + $0x8] sm:$0xff]  ;;  %s1077_s5 = smov [#allocation10]  }
 0x25d   :  { %v459_v15 = vpop.xlane.xlu0 %458  ;;  %s855_s7 = sshll.u32 %s1077_s5, 4  ;;  %s856_s7 = int_to_ptr.vmem [resolvable:$true] %s855_s7 }
 0x25e   :  { %v470_v23 = vsub.f32 %v466_v14, %v468_v22  ;;  %v465_v24 = vmul.f32 0.00390625, %v459_v15  ;;  %s1036_s8 = scalar_lea.vmem %s856_s7, 512  ;;  %p1041_p11 = scmp.lt.s32.totalorder %s856_s7, %s856_s7 }
 0x25f   :  { %p1037_p10 = scmp.ne.s32.totalorder %s856_s7, %s1036_s8  ;;  %p1042_p12 = scmp.lt.s32.totalorder %s1036_s8, %s1036_s8 }
 0x260   :  { %v472_v26 = vmax.f32 %v470_v23, 0.0  ;;  %v469_v27 = vsub.f32 %v465_v24, %v467_v25 }
 0x261   :  { %p1043_p13 = por %p1042_p12, %p1041_p11 }
 0x262   :  { %v478_v28 = vadd.f32 1e-05, %v472_v26  ;;  %v471_v31 = vmax.f32 %v469_v27, 0.0 }
 0x263   :  { %p1044_p0 = pnand %p1043_p13, %p1037_p10 }
 0x264   :  { %962 = vrsqrt.f32 %v478_v28  ;;  %v477_v32 = vadd.f32 1e-05, %v471_v31 }
 0x266   :  { %964 = vrsqrt.f32 %v477_v32 }
 0x26e   :  { %v963_v39 = vpop.eup %962 }
 0x26f   :  { %v483_v40 = vmul.f32 %v963_v39, %v475_v33  ;;  %v484_v41 = vmul.f32 %v963_v39, %v476_v38 }
 0x270   :  { %v965_v42 = vpop.eup %964 }
 0x271   :  { %v491_v45 = vmul.f32 0.01, %v483_v40  ;;  %v492_v46 = vmul.f32 0.01, %v484_v41  ;;  %v481_v0 = vmul.f32 %v965_v42, %v473_v43  ;;  %v482_v2 = vmul.f32 %v965_v42, %v474_v44 }
 0x272   :  { %vm487_vm9 = vcmp.ge.f32.partialorder %v483_v40, 0.0  ;;  %vm488_vm10 = vcmp.ge.f32.partialorder %v484_v41, 0.0 }
 0x273   :  { %vm485_vm11 = vcmp.ge.f32.partialorder %v481_v0, 0.0  ;;  %vm486_vm12 = vcmp.ge.f32.partialorder %v482_v2, 0.0  ;;  %v489_v4 = vmul.f32 0.01, %v481_v0  ;;  %v490_v47 = vmul.f32 0.01, %v482_v2 }
 0x274   :  { %v1432_v48 = vsel %vm487_vm9, %v483_v40, %v491_v45  ;;  %v1434_v54 = vsel %vm488_vm10, %v484_v41, %v492_v46 }
 0x275   :  { %v1436_v56 = vsel %vm485_vm11, %v481_v0, %v489_v4  ;;  %v1438_v1 = vsel %vm486_vm12, %v482_v2, %v490_v47 }
 0x276   :  { %505 = vrot.lane.b32.xlu1 %v1438_v1, %s1069_s15  ;;  %501 = vrot.lane.b32.xlu0 %v1436_v56, %s1069_s15  ;;  %v926_v49 = vpack.c.bf16 %v1434_v54, %v1438_v1  ;;  %v928_v55 = vpack.c.bf16 %v1432_v48, %v1436_v56 }
 0x27a   :  { %521 = vrot.lane.b32.xlu1 %v1436_v56, %s1067_s10  ;;  %507 = vrot.lane.b32.xlu0 %v1434_v54, %s1069_s15 }
 0x27e   :  { %525 = vrot.lane.b32.xlu1 %v1438_v1, %s1067_s10  ;;  %523 = vrot.lane.b32.xlu0 %v1432_v48, %s1067_s10 }
 0x282   :  { %541 = vrot.lane.b32.xlu1 %v1436_v56, %s1070_s0  ;;  %527 = vrot.lane.b32.xlu0 %v1434_v54, %s1067_s10 }
 0x286   :  { %545 = vrot.lane.b32.xlu1 %v1438_v1, %s1070_s0  ;;  %543 = vrot.lane.b32.xlu0 %v1432_v48, %s1070_s0 }
 0x28a   :  { %561 = vrot.lane.b32.xlu1 %v1436_v56, %s1071_s19  ;;  %547 = vrot.lane.b32.xlu0 %v1434_v54, %s1070_s0 }
 0x28e   :  { %565 = vrot.lane.b32.xlu1 %v1438_v1, %s1071_s19  ;;  %563 = vrot.lane.b32.xlu0 %v1432_v48, %s1071_s19 }
 0x292   :  { %567 = vrot.lane.b32.xlu0 %v1434_v54, %s1071_s19  ;;  %503 = vrot.lane.b32.xlu1 %v1432_v48, %s1069_s15 }
 0x296   :  { %587 = vrot.lane.b32.xlu0 %v1432_v48, %s1072_s20  ;;  %585 = vrot.lane.b32.xlu1 %v1436_v56, %s1072_s20 }
 0x29a   :  { %591 = vrot.lane.b32.xlu0 %v1434_v54, %s1072_s20  ;;  %589 = vrot.lane.b32.xlu1 %v1438_v1, %s1072_s20 }
 0x29e   :  { %607 = vrot.lane.b32.xlu0 %v1432_v48, %s1073_s2  ;;  %605 = vrot.lane.b32.xlu1 %v1436_v56, %s1073_s2 }
 0x2a2   :  { %611 = vrot.lane.b32.xlu0 %v1434_v54, %s1073_s2  ;;  %609 = vrot.lane.b32.xlu1 %v1438_v1, %s1073_s2 }
 0x2a6   :  { %627 = vrot.lane.b32.xlu0 %v1432_v48, %s1074_s21  ;;  %625 = vrot.lane.b32.xlu1 %v1436_v56, %s1074_s21 }
 0x2aa   :  { %631 = vrot.lane.b32.xlu0 %v1434_v54, %s1074_s21  ;;  %629 = vrot.lane.b32.xlu1 %v1438_v1, %s1074_s21 }
 0x2ae   :  { %647 = vrot.lane.b32.xlu0 %v1432_v48, %s1075_s22  ;;  %645 = vrot.lane.b32.xlu1 %v1436_v56, %s1075_s22 }
 0x2b2   :  { %651 = vrot.lane.b32.xlu0 %v1434_v54, %s1075_s22  ;;  %649 = vrot.lane.b32.xlu1 %v1438_v1, %s1075_s22 }
 0x2b6   :  { %710 = vperm.xlu0 %960, %v702_v5   ;;  %705 = vperm.xlu1 %961, %v701_v57  }
 0x2e8   :  { %v502_v58 = vpop.permute.xlu0 %501  ;;  %v506_v59 = vpop.permute.xlu1 %505 }
 0x2e9   :  { %v511_v14 = vsel %vm87_vm1, %v506_v59, %v502_v58  ;;  %v509_v15 = vsel %vm87_vm1, %v502_v58, %v506_v59 }
 0x2ea   :  { %v513_v24 = vmul.f32 %v511_v14, %v1271_v18  ;;  %v514_v32 = vmul.f32 %v509_v15, %v1274_v19 }
 0x2ec   :  { %v508_v60 = vpop.permute.xlu0 %507  ;;  %v522_v11 = vpop.permute.xlu1 %521 }
 0x2f0   :  { %v524_v61 = vpop.permute.xlu0 %523  ;;  %v526_v62 = vpop.permute.xlu1 %525 }
 0x2f1   :  { %v529_v27 = vsel %vm116_vm2, %v522_v11, %v526_v62  ;;  %v531_v42 = vsel %vm116_vm2, %v526_v62, %v522_v11 }
 0x2f2   :  { %v534_v43 = vmul.f32 %v529_v27, %v1294_v36  ;;  %v533_v3 = vmul.f32 %v531_v42, %v1291_v35 }
 0x2f4   :  { %v528_v63 = vpop.permute.xlu0 %527  ;;  %v542_v6 = vpop.permute.xlu1 %541 }
 0x2f5   :  { %v530_v23 = vsel %vm116_vm2, %v524_v61, %v528_v63  ;;  %v532_v33 = vsel %vm116_vm2, %v528_v63, %v524_v61 }
 0x2f6   :  { %v536_v38 = vmul.f32 %v530_v23, %v1294_v36  ;;  %v535_v2 = vmul.f32 %v532_v33, %v1291_v35 }
 0x2f8   :  { %v544_v9 = vpop.permute.xlu0 %543  ;;  %v546_v10 = vpop.permute.xlu1 %545  ;;  %v914_v47 = vpack.c.bf16 %v536_v38, %v534_v43  ;;  %v916_v61 = vpack.c.bf16 %v535_v2, %v533_v3 }
 0x2f9   :  { %v549_v4 = vsel %vm145_vm3, %v542_v6, %v546_v10  ;;  %v551_v5 = vsel %vm145_vm3, %v546_v10, %v542_v6 }
 0x2fa   :  { %v554_v57 = vmul.f32 %v549_v4, %v1314_v53 }
 0x2fc   :  { %v548_v17 = vpop.permute.xlu0 %547  ;;  %v562_v20 = vpop.permute.xlu1 %561 }
 0x2fd   :  { %v550_v41 = vsel %vm145_vm3, %v544_v9, %v548_v17 }
 0x300   :  { %v564_v21 = vpop.permute.xlu0 %563  ;;  %v566_v22 = vpop.permute.xlu1 %565 }
 0x301   :  { %v569_v11 = vsel %vm174_vm4, %v562_v20, %v566_v22 }
 0x302   :  { %v574_v6 = vmul.f32 %v569_v11, %v1334_v16 }
 0x304   :  { %v568_v25 = vpop.permute.xlu0 %567  ;;  %v504_v26 = vpop.permute.xlu1 %503 }
 0x305   :  { %v510_v28 = vsel %vm87_vm1, %v504_v26, %v508_v60  ;;  %v512_v31 = vsel %vm87_vm1, %v508_v60, %v504_v26  ;;  %v570_v36 = vsel %vm174_vm4, %v564_v21, %v568_v25  ;;  %v572_v35 = vsel %vm174_vm4, %v568_v25, %v564_v21 }
 0x306   :  { %v515_v39 = vmul.f32 %v512_v31, %v1271_v18  ;;  %v516_v40 = vmul.f32 %v510_v28, %v1274_v19  ;;  %v552_v18 = vsel %vm145_vm3, %v548_v17, %v544_v9  ;;  %v556_v19 = vmul.f32 %v550_v41, %v1314_v53 }
 0x307   :  { %v555_v60 = vmul.f32 %v552_v18, %v1311_v52  ;;  %v576_v62 = vmul.f32 %v570_v36, %v1334_v16  ;;  %v553_v9 = vmul.f32 %v551_v5, %v1311_v52  ;;  %v571_v53 = vsel %vm174_vm4, %v566_v22, %v562_v20 }
 0x308   :  { %v588_v44 = vpop.permute.xlu0 %587  ;;  %v586_v45 = vpop.permute.xlu1 %585  ;;  %v910_v46 = vpack.c.bf16 %v516_v40, %v514_v32  ;;  %v912_v0 = vpack.c.bf16 %v515_v39, %v513_v24  ;;  %v918_v63 = vpack.c.bf16 %v556_v19, %v554_v57  ;;  %v575_v14 = vmul.f32 %v572_v35, %v1331_v13 }
 0x309   :  { %v920_v15 = vpack.c.bf16 %v555_v60, %v553_v9  ;;  %v922_v23 = vpack.c.bf16 %v576_v62, %v574_v6  ;;  %v573_v21 = vmul.f32 %v571_v53, %v1331_v13  ;;  %v500_v9 = vld [vmem:[#allocation9 + $0x18] sm:$0xff] }
 0x30a   :  { %911 = vmatprep.subr.bf16.mxu1 %v910_v46 }
 0x30b   :  { %913 = vmatpush1.bf16.msra.mxu1 %v912_v0  ;;  %v924_v26 = vpack.c.bf16 %v575_v14, %v573_v21 }
 0x30c   :  { %v592_v58 = vpop.permute.xlu0 %591  ;;  %915 = vmatprep.subr.bf16.mxu1 %v914_v47  ;;  %v590_v59 = vpop.permute.xlu1 %589 }
 0x30d   :  { %v596_v24 = vsel %vm207_vm5, %v592_v58, %v588_v44  ;;  %v595_v52 = vsel %vm207_vm5, %v590_v59, %v586_v45  ;;  %v594_v16 = vsel %vm207_vm5, %v588_v44, %v592_v58  ;;  %v593_v22 = vsel %vm207_vm5, %v586_v45, %v590_v59 }
 0x30e   :  { %v600_v27 = vmul.f32 %v596_v24, %v1354_v37  ;;  %v598_v13 = vmul.f32 %v595_v52, %v1354_v37  ;;  %v599_v32 = vmul.f32 %v594_v16, %v1351_v34  ;;  %v597_v33 = vmul.f32 %v593_v22, %v1351_v34 }
 0x30f   :  { %917 = vmatpush1.bf16.msra.mxu1 %v916_v61 }
 0x310   :  { %v608_v10 = vpop.permute.xlu0 %607  ;;  %919 = vmatprep.subr.bf16.mxu1 %v918_v63  ;;  %v606_v17 = vpop.permute.xlu1 %605  ;;  %v930_v43 = vpack.c.bf16 %v600_v27, %v598_v13  ;;  %v932_v44 = vpack.c.bf16 %v599_v32, %v597_v33  ;;  %v497_v63 = vld [vmem:[#allocation9] sm:$0xff] }
 0x313   :  { %921 = vmatpush1.bf16.msra.mxu1 %v920_v15 }
 0x314   :  { %v612_v25 = vpop.permute.xlu0 %611  ;;  %923 = vmatprep.subr.bf16.mxu1 %v922_v23  ;;  %v610_v20 = vpop.permute.xlu1 %609 }
 0x315   :  { %v616_v28 = vsel %vm236_vm6, %v612_v25, %v608_v10  ;;  %v615_v31 = vsel %vm236_vm6, %v610_v20, %v606_v17  ;;  %v614_v37 = vsel %vm236_vm6, %v608_v10, %v612_v25  ;;  %v613_v40 = vsel %vm236_vm6, %v606_v17, %v610_v20 }
 0x316   :  { %v620_v41 = vmul.f32 %v616_v28, %v1380_v51  ;;  %v618_v42 = vmul.f32 %v615_v31, %v1380_v51  ;;  %v619_v34 = vmul.f32 %v614_v37, %v1377_v50  ;;  %v617_v54 = vmul.f32 %v613_v40, %v1377_v50 }
 0x317   :  { %925 = vmatpush1.bf16.msra.mxu1 %v924_v26 }
 0x318   :  { %v628_v38 = vpop.permute.xlu0 %627  ;;  %927 = vmatprep.subr.bf16.mxu1 %v926_v49  ;;  %v626_v39 = vpop.permute.xlu1 %625  ;;  %v936_v19 = vpack.c.bf16 %v619_v34, %v617_v54 }
 0x31b   :  { %929 = vmatpush1.bf16.msra.mxu1 %v928_v55  ;;  %v934_v55 = vpack.c.bf16 %v620_v41, %v618_v42 }
 0x31c   :  { %v632_v1 = vpop.permute.xlu0 %631  ;;  %931 = vmatprep.subr.bf16.mxu1 %v930_v43  ;;  %v630_v49 = vpop.permute.xlu1 %629 }
 0x31d   :  { %v634_v45 = vsel %vm265_vm7, %v628_v38, %v632_v1  ;;  %v636_v46 = vsel %vm265_vm7, %v632_v1, %v628_v38  ;;  %v633_v51 = vsel %vm265_vm7, %v626_v39, %v630_v49  ;;  %v635_v48 = vsel %vm265_vm7, %v630_v49, %v626_v39 }
 0x31e   :  { %v640_v56 = vmul.f32 %v636_v46, %v1400_v8  ;;  %v638_v50 = vmul.f32 %v635_v48, %v1400_v8  ;;  %v639_v0 = vmul.f32 %v634_v45, %v1397_v7  ;;  %v637_v2 = vmul.f32 %v633_v51, %v1397_v7 }
 0x31f   :  { %933 = vmatpush1.bf16.msra.mxu1 %v932_v44 }
 0x320   :  { %v648_v4 = vpop.permute.xlu0 %647  ;;  %935 = vmatprep.subr.bf16.mxu1 %v934_v55  ;;  %v646_v18 = vpop.permute.xlu1 %645  ;;  %v938_v47 = vpack.c.bf16 %v640_v56, %v638_v50  ;;  %v940_v5 = vpack.c.bf16 %v639_v0, %v637_v2 }
 0x323   :  { %937 = vmatpush1.bf16.msra.mxu1 %v936_v19 }
 0x324   :  { %v652_v3 = vpop.permute.xlu0 %651  ;;  %939 = vmatprep.subr.bf16.mxu1 %v938_v47  ;;  %v650_v36 = vpop.permute.xlu1 %649 }
 0x325   :  { %v654_v57 = vsel %vm294_vm8, %v648_v4, %v652_v3  ;;  %v656_v8 = vsel %vm294_vm8, %v652_v3, %v648_v4  ;;  %v653_v58 = vsel %vm294_vm8, %v646_v18, %v650_v36  ;;  %v655_v7 = vsel %vm294_vm8, %v650_v36, %v646_v18 }
 0x326   :  { %v659_v59 = vmul.f32 %v1415_v29, %v654_v57  ;;  %v660_v60 = vmul.f32 %v1417_v30, %v656_v8  ;;  %v657_v11 = vmul.f32 %v1415_v29, %v653_v58  ;;  %v658_v61 = vmul.f32 %v1417_v30, %v655_v7 }
 0x327   :  { %941 = vmatpush1.bf16.msra.mxu1 %v940_v5 }
 0x328   :  { %v942_v35 = vpack.c.bf16 %v660_v60, %v658_v61  ;;  %v944_v62 = vpack.c.bf16 %v659_v59, %v657_v11 }
 0x32a   :  { %943 = vmatprep.subr.bf16.mxu1 %v942_v35 }
 0x32b   :  { %945 = vmatpush1.bf16.msra.mxu1 %v944_v62 }
 0x32e   :  { %784 = vmatmul.mubr.f32.vlgmr.msra.gmra.mrb[0].mxu1 %v497_v63 }
 0x32f   :  { %873 = vmatprep.mubr.msk.f32.mxu1 %vm363_vm0, %v500_v9 }
 0x332   :  { %790 = vmatmul.mubr.f32.gmra.mrb[2].mxu1 %v499_v12 }
 0x335   :  { %v706_v53 = vpop.permute.xlu1 %705  ;;  %v711_v29 = vpop.permute.xlu0 %710 }
 0x401   :  { %v785_v6 = vpop.f32.mrb[0].mxu1 }
 0x402   :  { %v786_v10 = vadd.f32 %v785_v6, %v706_v53  ;;  %v787_v17 = vpop.f32.mrb[1].mxu1 }
 0x403   :  { %v788_v14 = vadd.f32 %v787_v17, %v706_v53 }
 0x404   :  { %v802_v16 = vmul.f32 %v786_v10, %v786_v10 }
 0x405   :  { %v791_v15 = vpop.f32.mrb[2].mxu1  ;;  %v796_v30 = vadd.f32 %v788_v14, %v786_v10  ;;  %v803_v22 = vmul.f32 %v788_v14, %v788_v14 }
 0x406   :  { %v792_v23 = vadd.f32 %v791_v15, %v711_v29  ;;  %v793_v21 = vpop.f32.mrb[3].mxu1 }
 0x407   :  { %v794_v24 = vadd.f32 %v793_v21, %v711_v29  ;;  %797 = vadd.xlane.f32.xlu1 %v796_v30  ;;  %v806_v27 = vadd.f32 %v803_v22, %v802_v16 }
 0x408   :  { %v804_v52 = vmul.f32 %v792_v23, %v792_v23 }
 0x409   :  { %v799_v25 = vadd.f32 %v794_v24, %v792_v23  ;;  %v805_v20 = vmul.f32 %v794_v24, %v794_v24 }
 0x40b   :  { %800 = vadd.xlane.f32.xlu0 %v799_v25  ;;  %v809_v26 = vadd.f32 %v805_v20, %v804_v52 }
 0x40d   :  { %810 = vadd.xlane.f32.xlu1 %v809_v26 }
 0x40f   :  { %807 = vadd.xlane.f32.xlu0 %v806_v27 }
 0x494   :  { %v798_v13 = vpop.xlane.xlu1 %797 }
 0x495   :  { %v812_v31 = vmul.f32 0.00390625, %v798_v13 }
 0x497   :  { %v816_v42 = vmul.f32 %v812_v31, %v812_v31  ;;  %v822_v51 = vsub.f32 %v786_v10, %v812_v31  ;;  %v823_v48 = vsub.f32 %v788_v14, %v812_v31 }
 0x498   :  { %v801_v28 = vpop.xlane.xlu0 %800 }
 0x499   :  { %v813_v32 = vmul.f32 0.00390625, %v801_v28 }
 0x49a   :  { %v811_v33 = vpop.xlane.xlu1 %810 }
 0x49b   :  { %v817_v38 = vmul.f32 %v813_v32, %v813_v32  ;;  %v815_v39 = vmul.f32 0.00390625, %v811_v33  ;;  %v824_v44 = vsub.f32 %v792_v23, %v813_v32  ;;  %v825_v45 = vsub.f32 %v794_v24, %v813_v32 }
 0x49c   :  { %v808_v37 = vpop.xlane.xlu0 %807 }
 0x49d   :  { %v819_v40 = vsub.f32 %v815_v39, %v817_v38  ;;  %v814_v41 = vmul.f32 0.00390625, %v808_v37 }
 0x49f   :  { %v821_v43 = vmax.f32 %v819_v40, 0.0  ;;  %v818_v34 = vsub.f32 %v814_v41, %v816_v42 }
 0x4a1   :  { %v827_v54 = vadd.f32 1e-05, %v821_v43  ;;  %v820_v1 = vmax.f32 %v818_v34, 0.0 }
 0x4a3   :  { %966 = vrsqrt.f32 %v827_v54  ;;  %v826_v49 = vadd.f32 1e-05, %v820_v1 }
 0x4a5   :  { %968 = vrsqrt.f32 %v826_v49 }
 0x4ad   :  { %v967_v46 = vpop.eup %966 }
 0x4ae   :  { %v832_v56 = vmul.f32 %v967_v46, %v824_v44  ;;  %v833_v50 = vmul.f32 %v967_v46, %v825_v45 }
 0x4af   :  { %v969_v55 = vpop.eup %968 }
 0x4b0   :  { %v830_v0 = vmul.f32 %v969_v55, %v822_v51  ;;  %v831_v2 = vmul.f32 %v969_v55, %v823_v48  ;;  %vm836_vm13 = vcmp.ge.f32.partialorder %v832_v56, 0.0  ;;  %vm837_vm14 = vcmp.ge.f32.partialorder %v833_v50, 0.0 }
 0x4b1   :  { %v840_v4 = vmul.f32 0.01, %v832_v56  ;;  %v841_v18 = vmul.f32 0.01, %v833_v50 }
 0x4b2   :  { %vm834_vm15 = vcmp.ge.f32.partialorder %v830_v0, 0.0  ;;  %vm835_vm0 = vcmp.ge.f32.partialorder %v831_v2, 0.0  ;;  %v838_v19 = vmul.f32 0.01, %v830_v0  ;;  %v839_v47 = vmul.f32 0.01, %v831_v2 }
 0x4b3   :  { %v844_v3 = vsel %vm836_vm13, %v832_v56, %v840_v4  ;;  %v845_v36 = vsel %vm837_vm14, %v833_v50, %v841_v18 }
 0x4b4   :  { %v842_v5 = vsel %vm834_vm15, %v830_v0, %v838_v19  ;;  %v843_v57 = vsel %vm835_vm0, %v831_v2, %v839_v47  ;;  %848 = vst [vmem:[#allocation10 + $0x10] sm:$0xff] %v844_v3  ;;  %849 = vst [vmem:[#allocation10 + $0x18] sm:$0xff] %v845_v36 }
 0x4b5   :  { %846 = vst [vmem:[#allocation10] sm:$0xff] %v842_v5  ;;  %847 = vst [vmem:[#allocation10 + $0x8] sm:$0xff] %v843_v57 }
 0x4b6   :  { %1047 = shalt.err (!%p1044_p0)
}
 0x4b7   :  { %s1048_s11 = scalar_lea.hbm %s1639_s6, 512 }
 0x4b8   :  { %p1049_p1 = scmp.ne.s32.totalorder %s1639_s6, %s1048_s11  ;;  %p1052_p2 = scmp.lt.u32.totalorder %s1048_s11, %s1639_s6 }
 0x4ba   :  { %p1054_p3 = pnand %p1052_p2, %p1049_p1 }
 0x4bc   :  { %1057 = shalt.err (!%p1054_p3)
}
 0x4bd   :  { %861 = dma.vmem_to_hbm [thread:$0]  %s856_s7, 512, %s1639_s6, [#allocation6], %s1066_s9, %s1066_s9, %s1067_s10  }
 0x4be   :  { %1062 = dma.done.wait [#allocation6], 512  }
 0x4bf   :  { %1063 = vsyncadd [#allocation6], 4294966784 }
 0x4c0   :  { %865 = vsyncpa [#allocation5], 1 }
 0x4c1   :  { %866 = vsyncpa [#allocation8], 1 }
 0x4c2   :  { %867 = vsyncpa [#allocation6], 1 }

</bundles_post_ra>
